<compile_context>
chip_gen: v5e
topology: v5e:2x2
jax: 0.10.0
libtpu: 0.0.40
codegen_flags: <defaults>
</compile_context>

<pallas_src>
import jax
import jax.numpy as jnp
from jax.experimental import pallas as pl
from jax.experimental.pallas import tpu as pltpu


def _round_up(x, m):
    return (x + m - 1) // m * m


def mlp_kernel(x_ref, w1_ref, b1_ref, w2_ref, b2_ref, w3_ref, b3_ref, o_ref):
    # x tile: [TILE_B, 784] f32 (cast to bf16 here, hidden under the DMA);
    # weights bf16; biases f32; output bf16.
    x = x_ref[...].astype(jnp.bfloat16)

    # Linear 1 + ReLU   (f32 accumulation on the MXU, bias/ReLU on the VPU)
    h1 = jnp.dot(x, w1_ref[...], preferred_element_type=jnp.float32) + b1_ref[...]
    h1 = jnp.maximum(h1, 0.0)

    # Dropout (eval mode) == identity

    # Linear 2 + ReLU
    h2 = jnp.dot(h1.astype(jnp.bfloat16), w2_ref[...],
                 preferred_element_type=jnp.float32) + b2_ref[...]
    h2 = jnp.maximum(h2, 0.0)

    # Dropout (eval mode) == identity

    # Linear 3 (logits, no activation) -- lane-dense padded bf16 output slab
    out = jnp.dot(h2.astype(jnp.bfloat16), w3_ref[...],
                  preferred_element_type=jnp.float32) + b3_ref[...]
    o_ref[...] = out.astype(o_ref.dtype)


def _prepare_params(params):
    """Zero-pad output feature dims to multiples of 128, cast weights to bf16.

    The input feature dim (K=784) is intentionally NOT padded: padding it only
    adds HBM bytes on the dominant x stream for zero benefit.
    """
    w1, b1 = params["w1"], params["b1"]
    w2, b2 = params["w2"], params["b2"]
    w3, b3 = params["w3"], params["b3"]

    H1 = _round_up(w1.shape[1], 128)   # 128 -> 128
    H2 = _round_up(w2.shape[1], 128)   # 64  -> 128
    N = _round_up(w3.shape[1], 128)    # 10  -> 128

    def pad_w(w, rows, cols):
        return jnp.pad(
            w, ((0, rows - w.shape[0]), (0, cols - w.shape[1]))
        ).astype(jnp.bfloat16)

    def pad_b(b, cols):
        return jnp.pad(b, ((0, 0), (0, cols - b.shape[1]))).astype(jnp.float32)

    return {
        "w1": pad_w(w1, w1.shape[0], H1), "b1": pad_b(b1, H1),
        "w2": pad_w(w2, H1, H2), "b2": pad_b(b2, H2),
        "w3": pad_w(w3, H2, N), "b3": pad_b(b3, N),
        "N": N,
    }


def _pick_tile_b(B, max_tile_b):
    """Batch tile: small for latency calls, big (and >=2 grid steps) for throughput."""
    if B <= 64:
        return _round_up(B, 16)           # avoid padding a tiny batch to 128 rows
    tile_b = min(max_tile_b, _round_up(B, 128))
    # Keep at least 2 grid steps so v7x's 2 TensorCores both get work.
    if _round_up(B, tile_b) == tile_b and tile_b > 128:
        tile_b = max(128, _round_up((tile_b + 1) // 2, 128))
    return tile_b


def custom_nn_forward(x, params, max_tile_b=2048):
    """x: [B, ...] (flattened to [B, input_size]); params: dict of f32 weights/biases."""
    B = x.shape[0]
    x2d = x.reshape(B, -1).astype(jnp.float32)   # mirrors `x.view(x.size(0), -1)`
    K = x2d.shape[1]
    num_classes = params["w3"].shape[1]
    assert K == params["w1"].shape[0], "input feature dim mismatch"

    p = _prepare_params(params)
    N = p["N"]

    tile_b = _pick_tile_b(B, max_tile_b)
    b_pad = _round_up(B, tile_b)
    if b_pad != B:
        # Row-only zero pad (no feature pad, no dtype change) -> padded rows
        # are mathematically inert and sliced off below.
        x2d = jnp.pad(x2d, ((0, b_pad - B), (0, 0)))

    grid = (b_pad // tile_b,)

    resident = lambda shape: pl.BlockSpec(shape, lambda i: (0, 0))

    out_pad = pl.pallas_call(
        mlp_kernel,
        out_shape=jax.ShapeDtypeStruct((b_pad, N), jnp.bfloat16),
        grid=grid,
        in_specs=[
            pl.BlockSpec((tile_b, K), lambda i: (i, 0)),   # x: streamed per tile
            resident(p["w1"].shape), resident(p["b1"].shape),
            resident(p["w2"].shape), resident(p["b2"].shape),
            resident(p["w3"].shape), resident(p["b3"].shape),
        ],
        out_specs=pl.BlockSpec((tile_b, N), lambda i: (i, 0)),
        compiler_params=pltpu.CompilerParams(
            dimension_semantics=("parallel",),
        ),
    )(x2d, p["w1"], p["b1"], p["w2"], p["b2"], p["w3"], p["b3"])

    # Slice off padded rows/classes; return f32 to match the PyTorch module.
    return out_pad[:B, :num_classes].astype(jnp.float32)


def init_params(key, input_size=784, hidden_sizes=(128, 64), num_classes=10):
    """Deterministic init mimicking nn.Linear's uniform(-1/sqrt(fan_in), 1/sqrt(fan_in))."""
    sizes = [input_size, *hidden_sizes, num_classes]
    params = {}
    keys = jax.random.split(key, 2 * (len(sizes) - 1))
    for i in range(len(sizes) - 1):
        fan_in, fan_out = sizes[i], sizes[i + 1]
        bound = 1.0 / (fan_in ** 0.5)
        # stored as [in, out] so the kernel does x @ W
        params[f"w{i + 1}"] = jax.random.uniform(
            keys[2 * i], (fan_in, fan_out), jnp.float32, -bound, bound)
        params[f"b{i + 1}"] = jax.random.uniform(
            keys[2 * i + 1], (1, fan_out), jnp.float32, -bound, bound)
    return params


def reference_forward_f32(x, params):
    B = x.shape[0]
    h = x.reshape(B, -1).astype(jnp.float32)
    h = jnp.maximum(h @ params["w1"] + params["b1"], 0.0)
    h = jnp.maximum(h @ params["w2"] + params["b2"], 0.0)
    return h @ params["w3"] + params["b3"]


def reference_forward_bf16(x, params):
    # Same math as the kernel: bf16 matmul inputs, f32 accumulation, bf16 logits.
    B = x.shape[0]
    bf = jnp.bfloat16
    h = x.reshape(B, -1).astype(jnp.float32).astype(bf)
    h = jnp.maximum(
        jnp.dot(h, params["w1"].astype(bf), preferred_element_type=jnp.float32)
        + params["b1"], 0.0)
    h = jnp.maximum(
        jnp.dot(h.astype(bf), params["w2"].astype(bf), preferred_element_type=jnp.float32)
        + params["b2"], 0.0)
    out = (jnp.dot(h.astype(bf), params["w3"].astype(bf),
                   preferred_element_type=jnp.float32) + params["b3"])
    return out.astype(bf).astype(jnp.float32)


if __name__ == "__main__":
    key = jax.random.PRNGKey(0)
    k_param, k_x, k_x2 = jax.random.split(key, 3)

    params = init_params(k_param, input_size=784, hidden_sizes=(128, 64), num_classes=10)

    # Small MNIST-like input: batch=2, NCHW [2, 1, 28, 28] -> flattened to [2, 784]
    x = jax.random.normal(k_x, (2, 1, 28, 28), dtype=jnp.float32)

    out = custom_nn_forward(x, params)
    jax.block_until_ready(out)
    assert out.shape == (2, 10)
    assert out.dtype == jnp.float32

    # Matches the bf16-input / f32-accumulate / bf16-logits math tightly...
    ref_bf16 = reference_forward_bf16(x, params)
    assert jnp.allclose(out, ref_bf16, atol=5e-3, rtol=5e-3)

    # ...and the pure-f32 PyTorch-equivalent reference within bf16 tolerance.
    ref_f32 = reference_forward_f32(x, params)
    assert jnp.allclose(out, ref_f32, atol=5e-2, rtol=5e-2)

    # Exercise the multi-tile (>= 2 grid steps) + batch-padding path.
    x_big = jax.random.normal(k_x2, (300, 784), dtype=jnp.float32)
    out_big = custom_nn_forward(x_big, params)
    jax.block_until_ready(out_big)
    assert out_big.shape == (300, 10)
    assert jnp.allclose(out_big, reference_forward_f32(x_big, params),
                        atol=5e-2, rtol=5e-2)

    print("KERNEL_OK")
</pallas_src>

<mosaic_0001>
module attributes {stable_mosaic.version = 11 : i64} {
  func.func @mlp_kernel(%arg0: i32, %arg1: memref<16x784xf32, #tpu.memory_space<vmem>>, %arg2: memref<784x128xbf16, #tpu.memory_space<vmem>>, %arg3: memref<1x128xf32, #tpu.memory_space<vmem>>, %arg4: memref<128x128xbf16, #tpu.memory_space<vmem>>, %arg5: memref<1x128xf32, #tpu.memory_space<vmem>>, %arg6: memref<128x128xbf16, #tpu.memory_space<vmem>>, %arg7: memref<1x128xf32, #tpu.memory_space<vmem>>, %arg8: memref<16x128xbf16, #tpu.memory_space<vmem>>) attributes {dimension_semantics = [#tpu.dimension_semantics<parallel>], iteration_bounds = array<i64: 1>, scalar_prefetch = 0 : i64, scratch_operands = 0 : i64, tpu.core_type = #tpu.core_type<tc>, window_params = [{transform_indices = @transform_0, window_bounds = array<i64: 16, 784>}, {pipeline_mode = #tpu.pipeline_mode<synchronous>, transform_indices = @transform_1, window_bounds = array<i64: 784, 128>}, {pipeline_mode = #tpu.pipeline_mode<synchronous>, transform_indices = @transform_2, window_bounds = array<i64: 1, 128>}, {pipeline_mode = #tpu.pipeline_mode<synchronous>, transform_indices = @transform_3, window_bounds = array<i64: 128, 128>}, {pipeline_mode = #tpu.pipeline_mode<synchronous>, transform_indices = @transform_4, window_bounds = array<i64: 1, 128>}, {pipeline_mode = #tpu.pipeline_mode<synchronous>, transform_indices = @transform_5, window_bounds = array<i64: 128, 128>}, {pipeline_mode = #tpu.pipeline_mode<synchronous>, transform_indices = @transform_6, window_bounds = array<i64: 1, 128>}, {transform_indices = @transform_7, window_bounds = array<i64: 16, 128>}]} {
    %c0 = arith.constant 0 : index
    %c0_0 = arith.constant 0 : index
    %0 = vector.load %arg1[%c0, %c0_0] : memref<16x784xf32, #tpu.memory_space<vmem>>, vector<16x784xf32>
    %1 = arith.truncf %0 : vector<16x784xf32> to vector<16x784xbf16>
    %c0_1 = arith.constant 0 : index
    %c0_2 = arith.constant 0 : index
    %2 = vector.load %arg2[%c0_1, %c0_2] : memref<784x128xbf16, #tpu.memory_space<vmem>>, vector<784x128xbf16>
    %cst = arith.constant dense<0.000000e+00> : vector<16x128xf32>
    %3 = tpu.matmul %1, %2, %cst {dimension_numbers = #tpu.dot_dimension_numbers<[1], [0], [0], [1], [0, 0, 1, 1], [], []>} : vector<16x784xbf16>, vector<784x128xbf16>, vector<16x128xf32> -> vector<16x128xf32>
    %c0_3 = arith.constant 0 : index
    %c0_4 = arith.constant 0 : index
    %4 = vector.load %arg3[%c0_3, %c0_4] : memref<1x128xf32, #tpu.memory_space<vmem>>, vector<1x128xf32>
    %5 = vector.broadcast %4 : vector<1x128xf32> to vector<16x128xf32>
    %6 = arith.addf %3, %5 : vector<16x128xf32>
    %cst_5 = arith.constant 0.000000e+00 : f32
    %7 = vector.broadcast %cst_5 : f32 to vector<16x128xf32>
    %8 = arith.maximumf %6, %7 : vector<16x128xf32>
    %9 = arith.truncf %8 : vector<16x128xf32> to vector<16x128xbf16>
    %c0_6 = arith.constant 0 : index
    %c0_7 = arith.constant 0 : index
    %10 = vector.load %arg4[%c0_6, %c0_7] : memref<128x128xbf16, #tpu.memory_space<vmem>>, vector<128x128xbf16>
    %cst_8 = arith.constant dense<0.000000e+00> : vector<16x128xf32>
    %11 = tpu.matmul %9, %10, %cst_8 {dimension_numbers = #tpu.dot_dimension_numbers<[1], [0], [0], [1], [0, 0, 1, 1], [], []>} : vector<16x128xbf16>, vector<128x128xbf16>, vector<16x128xf32> -> vector<16x128xf32>
    %c0_9 = arith.constant 0 : index
    %c0_10 = arith.constant 0 : index
    %12 = vector.load %arg5[%c0_9, %c0_10] : memref<1x128xf32, #tpu.memory_space<vmem>>, vector<1x128xf32>
    %13 = vector.broadcast %12 : vector<1x128xf32> to vector<16x128xf32>
    %14 = arith.addf %11, %13 : vector<16x128xf32>
    %cst_11 = arith.constant 0.000000e+00 : f32
    %15 = vector.broadcast %cst_11 : f32 to vector<16x128xf32>
    %16 = arith.maximumf %14, %15 : vector<16x128xf32>
    %17 = arith.truncf %16 : vector<16x128xf32> to vector<16x128xbf16>
    %c0_12 = arith.constant 0 : index
    %c0_13 = arith.constant 0 : index
    %18 = vector.load %arg6[%c0_12, %c0_13] : memref<128x128xbf16, #tpu.memory_space<vmem>>, vector<128x128xbf16>
    %cst_14 = arith.constant dense<0.000000e+00> : vector<16x128xf32>
    %19 = tpu.matmul %17, %18, %cst_14 {dimension_numbers = #tpu.dot_dimension_numbers<[1], [0], [0], [1], [0, 0, 1, 1], [], []>} : vector<16x128xbf16>, vector<128x128xbf16>, vector<16x128xf32> -> vector<16x128xf32>
    %c0_15 = arith.constant 0 : index
    %c0_16 = arith.constant 0 : index
    %20 = vector.load %arg7[%c0_15, %c0_16] : memref<1x128xf32, #tpu.memory_space<vmem>>, vector<1x128xf32>
    %21 = vector.broadcast %20 : vector<1x128xf32> to vector<16x128xf32>
    %22 = arith.addf %19, %21 : vector<16x128xf32>
    %23 = arith.truncf %22 : vector<16x128xf32> to vector<16x128xbf16>
    %c0_17 = arith.constant 0 : index
    %c0_18 = arith.constant 0 : index
    %24 = vector.load %arg8[%c0_17, %c0_18] : memref<16x128xbf16, #tpu.memory_space<vmem>>, vector<16x128xbf16>
    tpu.vector_store %arg8[%c0_17, %c0_18], %23 {strides = array<i32>} : memref<16x128xbf16, #tpu.memory_space<vmem>>, vector<16x128xbf16>,
    return
  }
  func.func @transform_0(%arg0: i32) -> (i32, i32) {
    %c0_i32 = arith.constant 0 : i32
    %c0_i32_0 = arith.constant 0 : i32
    return %arg0, %c0_i32 : i32, i32
  }
  func.func @transform_1(%arg0: i32) -> (i32, i32) {
    %c0_i32 = arith.constant 0 : i32
    %c0_i32_0 = arith.constant 0 : i32
    %c0_i32_1 = arith.constant 0 : i32
    return %c0_i32, %c0_i32_0 : i32, i32
  }
  func.func @transform_2(%arg0: i32) -> (i32, i32) {
    %c0_i32 = arith.constant 0 : i32
    %c0_i32_0 = arith.constant 0 : i32
    %c0_i32_1 = arith.constant 0 : i32
    return %c0_i32, %c0_i32_0 : i32, i32
  }
  func.func @transform_3(%arg0: i32) -> (i32, i32) {
    %c0_i32 = arith.constant 0 : i32
    %c0_i32_0 = arith.constant 0 : i32
    %c0_i32_1 = arith.constant 0 : i32
    return %c0_i32, %c0_i32_0 : i32, i32
  }
  func.func @transform_4(%arg0: i32) -> (i32, i32) {
    %c0_i32 = arith.constant 0 : i32
    %c0_i32_0 = arith.constant 0 : i32
    %c0_i32_1 = arith.constant 0 : i32
    return %c0_i32, %c0_i32_0 : i32, i32
  }
  func.func @transform_5(%arg0: i32) -> (i32, i32) {
    %c0_i32 = arith.constant 0 : i32
    %c0_i32_0 = arith.constant 0 : i32
    %c0_i32_1 = arith.constant 0 : i32
    return %c0_i32, %c0_i32_0 : i32, i32
  }
  func.func @transform_6(%arg0: i32) -> (i32, i32) {
    %c0_i32 = arith.constant 0 : i32
    %c0_i32_0 = arith.constant 0 : i32
    %c0_i32_1 = arith.constant 0 : i32
    return %c0_i32, %c0_i32_0 : i32, i32
  }
  func.func @transform_7(%arg0: i32) -> (i32, i32) {
    %c0_i32 = arith.constant 0 : i32
    %c0_i32_0 = arith.constant 0 : i32
    return %arg0, %c0_i32 : i32, i32
  }
}

</mosaic_0001>

<bundles_post_ra>
// kernel: tpu_custom_call.1
= control target key start
LH: loop header
LB: loop body
LE: loop exit
PB: predicated region body
PF: predicated region fallthrough
CT: control target
= control target key end

     0   :  { %12 = vsyncpa [#allocation3], 0  ;;  %s1361_s0 = inlined_call_operand.hbm [shape: f32[16,784], index: 0, kind: input, shape index: {}]   ;;  %s1362_s1 = inlined_call_operand.hbm [shape: bf16[784,128], index: 1, kind: input, shape index: {}]   ;;  %s1363_s2 = inlined_call_operand.vmem [shape: f32[1,128], index: 2, kind: input, shape index: {}]   ;;  %s1364_s3 = inlined_call_operand.hbm [shape: bf16[128,128], index: 3, kind: input, shape index: {}]   ;;  %s1365_s4 = inlined_call_operand.vmem [shape: f32[1,128], index: 4, kind: input, shape index: {}]   ;;  %s1366_s5 = inlined_call_operand.hbm [shape: bf16[128,128], index: 5, kind: input, shape index: {}]   ;;  %s1367_s6 = inlined_call_operand.vmem [shape: f32[1,128], index: 6, kind: input, shape index: {}]   ;;  %s1368_s7 = inlined_call_operand.hbm [shape: bf16[16,128], index: 7, kind: output, shape index: {}]  }
   0x1   :  { %13 = vsyncpa [#allocation6], 0 }
   0x2   :  { %14 = vsyncpa [#allocation9], 0  ;;  %s33_s26 = sshll.u32 %s1362_s1, 4  ;;  %s34_s26 = int_to_ptr.hbm [resolvable:$true] %s33_s26 }
   0x3   :  { %15 = vsyncpa [#allocation4], 0  ;;  %s1276_s27 = smov [#allocation5]   ;;  %s20_s8 = sshll.u32 %s1361_s0, 4  ;;  %s21_s8 = int_to_ptr.hbm [resolvable:$true] %s20_s8 }
   0x4   :  { %s35_s28 = sshll.u32 %s1276_s27, 4  ;;  %s1277_s9 = smov 64   ;;  %s36_s28 = int_to_ptr.vmem [resolvable:$true] %s35_s28 }
   0x5   :  { %s1278_s10 = smov 4   ;;  %s1279_s11 = smov [#allocation2]  }
   0x6   :  { %41 = dma.hbm_to_vmem [thread:$0]  %s34_s26, 6272, %s36_s28, [#allocation6], %s1277_s9, %s1277_s9, %s1278_s10  }
   0x7   :  { %s22_s12 = sshll.u32 %s1279_s11, 4  ;;  %s1280_s1 = smov 896   ;;  %s23_s12 = int_to_ptr.vmem [resolvable:$true] %s22_s12 }
   0x8   :  { %s1281_s13 = smov 56   ;;  %s48_s16 = sshll.u32 %s1364_s3, 4  ;;  %s49_s16 = int_to_ptr.hbm [resolvable:$true] %s48_s16 }
   0x9   :  { %28 = dma.hbm_to_vmem [thread:$0]  %s21_s8, 1792, %s23_s12, [#allocation3], %s1280_s1, %s1280_s1, %s1281_s13  }
   0xa   :  { %s1282_s17 = smov [#allocation7]   ;;  %s63_s20 = sshll.u32 %s1366_s5, 4  ;;  %s64_s20 = int_to_ptr.hbm [resolvable:$true] %s63_s20 }
   0xb   :  { %s50_s0 = sshll.u32 %s1282_s17, 4  ;;  %s1283_s21 = smov [#allocation8]   ;;  %s51_s0 = int_to_ptr.vmem [resolvable:$true] %s50_s0 }
   0xc   :  { %56 = dma.hbm_to_vmem [thread:$0]  %s49_s16, 1024, %s51_s0, [#allocation6], %s1277_s9, %s1277_s9, %s1278_s10  }
   0xd   :  { %s65_s22 = sshll.u32 %s1283_s21, 4  ;;  %s66_s22 = int_to_ptr.vmem [resolvable:$true] %s65_s22 }
   0xe   :  { %71 = dma.hbm_to_vmem [thread:$0]  %s64_s20, 1024, %s66_s22, [#allocation9], %s1277_s9, %s1277_s9, %s1278_s10  }
   0xf   :  { %1268 = dma.done.wait [#allocation3], 1792  }
  0x10   :  { %1269 = vsyncadd [#allocation3], 4294965504 }
  0x11   :  { %1270 = dma.done.wait [#allocation6], 7296  }
  0x12   :  { %1271 = vsyncadd [#allocation6], 4294960000 }
  0x13   :  { %1272 = dma.done.wait [#allocation9], 1024  }
  0x14   :  { %1273 = vsyncadd [#allocation9], 4294966272  ;;  %v1073_v0 = vld [vmem:[#allocation5 + $0x38] sm:$0xff]  ;;  %v1072_v4 = vld [vmem:[#allocation5 + $0x30] sm:$0xff]  ;;  %vm508_vm0 = vcmask 130048   ;;  %s1284_s26 = smov [#allocation10]  }
  0x15   :  { %v1081_v1 = vld [vmem:[#allocation5 + $0x78] sm:$0xff]  ;;  %512 = vmatpush.bf16.msra.mxu0 %v1073_v0  ;;  %v1080_v5 = vld [vmem:[#allocation5 + $0x70] sm:$0xff]  ;;  %v1071_v8 = vld [vmem:[#allocation5 + $0x28] sm:$0xff]  ;;  %s788_s27 = sshll.u32 %s1284_s26, 4  ;;  %s790_s30 = sshll.u32 %s1368_s7, 4  ;;  %s789_s27 = int_to_ptr.vmem [resolvable:$true] %s788_s27  ;;  %s791_s30 = int_to_ptr.hbm [resolvable:$true] %s790_s30 }
  0x16   :  { %v1089_v2 = vld [vmem:[#allocation5 + $0xb8] sm:$0xff]  ;;  %526 = vmatpush.bf16.msra.mxu1 %v1081_v1  ;;  %v1088_v6 = vld [vmem:[#allocation5 + $0xb0] sm:$0xff]  ;;  %v1079_v9 = vld [vmem:[#allocation5 + $0x68] sm:$0xff] }
  0x17   :  { %v1097_v3 = vld [vmem:[#allocation5 + $0xf8] sm:$0xff]  ;;  %540 = vmatpush.bf16.msra.mxu2 %v1089_v2  ;;  %v1096_v7 = vld [vmem:[#allocation5 + $0xf0] sm:$0xff]  ;;  %v1087_v10 = vld [vmem:[#allocation5 + $0xa8] sm:$0xff] }
  0x18   :  { %554 = vmatpush.bf16.msra.mxu3 %v1097_v3  ;;  %v1095_v11 = vld [vmem:[#allocation5 + $0xe8] sm:$0xff]  ;;  %v1070_v12 = vld [vmem:[#allocation5 + $0x20] sm:$0xff]  ;;  %v1069_v16 = vld [vmem:[#allocation5 + $0x18] sm:$0xff] }
  0x19   :  { %513 = vmatpush.bf16.msra.mxu0 %v1072_v4  ;;  %v1078_v13 = vld [vmem:[#allocation5 + $0x60] sm:$0xff]  ;;  %v1077_v17 = vld [vmem:[#allocation5 + $0x58] sm:$0xff]  ;;  %v1068_v20 = vld [vmem:[#allocation5 + $0x10] sm:$0xff] }
  0x1a   :  { %527 = vmatpush.bf16.msra.mxu1 %v1080_v5  ;;  %v1086_v14 = vld [vmem:[#allocation5 + $0xa0] sm:$0xff]  ;;  %v1085_v18 = vld [vmem:[#allocation5 + $0x98] sm:$0xff]  ;;  %v1076_v21 = vld [vmem:[#allocation5 + $0x50] sm:$0xff] }
  0x1b   :  { %541 = vmatpush.bf16.msra.mxu2 %v1088_v6  ;;  %v1094_v15 = vld [vmem:[#allocation5 + $0xe0] sm:$0xff]  ;;  %v1093_v19 = vld [vmem:[#allocation5 + $0xd8] sm:$0xff]  ;;  %v1084_v22 = vld [vmem:[#allocation5 + $0x90] sm:$0xff] }
  0x1c   :  { %555 = vmatpush.bf16.msra.mxu3 %v1096_v7  ;;  %v1092_v23 = vld [vmem:[#allocation5 + $0xd0] sm:$0xff]  ;;  %v1067_v24 = vld [vmem:[#allocation5 + $0x8] sm:$0xff]  ;;  %v1066_v28 = vld [vmem:[#allocation5] sm:$0xff] }
  0x1d   :  { %514 = vmatpush.bf16.msra.mxu0 %v1071_v8  ;;  %v1075_v25 = vld [vmem:[#allocation5 + $0x48] sm:$0xff]  ;;  %v1074_v29 = vld [vmem:[#allocation5 + $0x40] sm:$0xff]  ;;  %v91_v30 = vld [vmem:[#allocation2] sm:$0xff] }
  0x1e   :  { %528 = vmatpush.bf16.msra.mxu1 %v1079_v9  ;;  %v1083_v26 = vld [vmem:[#allocation5 + $0x88] sm:$0xff]  ;;  %v92_v32 = vld [vmem:[#allocation2 + $0x8] sm:$0xff]  ;;  %v99_v33 = vld [vmem:[#allocation2 + $0x40] sm:$0xff] }
  0x1f   :  { %542 = vmatpush.bf16.msra.mxu2 %v1087_v10  ;;  %v1091_v27 = vld [vmem:[#allocation5 + $0xc8] sm:$0xff]  ;;  %v1105_v34 = vld [vmem:[#allocation5 + $0x138] sm:$0xff]  ;;  %v1082_v36 = vld [vmem:[#allocation5 + $0x80] sm:$0xff]  ;;  %v106_v43 = vpack.c.bf16 %v99_v33, %v92_v32 }
  0x20   :  { %556 = vmatpush.bf16.msra.mxu3 %v1095_v11  ;;  %v98_v31 = vld [vmem:[#allocation2 + $0x38] sm:$0xff]  ;;  %v1113_v35 = vld [vmem:[#allocation5 + $0x178] sm:$0xff]  ;;  %v1090_v37 = vld [vmem:[#allocation5 + $0xc0] sm:$0xff] }
  0x21   :  { %515 = vmatpush.bf16.msra.mxu0 %v1070_v12  ;;  %v93_v38 = vld [vmem:[#allocation2 + $0x10] sm:$0xff]  ;;  %v100_v39 = vld [vmem:[#allocation2 + $0x48] sm:$0xff]  ;;  %v105_v40 = vpack.c.bf16 %v98_v31, %v91_v30  ;;  %v94_v41 = vld [vmem:[#allocation2 + $0x18] sm:$0xff] }
  0x22   :  { %529 = vmatpush.bf16.msra.mxu1 %v1078_v13  ;;  %v101_v42 = vld [vmem:[#allocation2 + $0x50] sm:$0xff]  ;;  %v1104_v45 = vld [vmem:[#allocation5 + $0x130] sm:$0xff]  ;;  %v107_v47 = vpack.c.bf16 %v100_v39, %v93_v38  ;;  %v1103_v49 = vld [vmem:[#allocation5 + $0x128] sm:$0xff] }
  0x23   :  { %543 = vmatpush.bf16.msra.mxu2 %v1086_v14  ;;  %v1114_v44 = vld [vmem:[#allocation5 + $0x180] sm:$0xff]  ;;  %v1112_v46 = vld [vmem:[#allocation5 + $0x170] sm:$0xff]  ;;  %v108_v48 = vpack.c.bf16 %v101_v42, %v94_v41  ;;  %v1111_v50 = vld [vmem:[#allocation5 + $0x168] sm:$0xff] }
  0x24   :  { %557 = vmatpush.bf16.msra.mxu3 %v1094_v15  ;;  %v1102_v51 = vld [vmem:[#allocation5 + $0x120] sm:$0xff]  ;;  %v1101_v53 = vld [vmem:[#allocation5 + $0x118] sm:$0xff]  ;;  %v1100_v57 = vld [vmem:[#allocation5 + $0x110] sm:$0xff] }
  0x25   :  { %516 = vmatpush.bf16.msra.mxu0 %v1069_v16  ;;  %v1110_v52 = vld [vmem:[#allocation5 + $0x160] sm:$0xff]  ;;  %v1109_v54 = vld [vmem:[#allocation5 + $0x158] sm:$0xff]  ;;  %v1108_v58 = vld [vmem:[#allocation5 + $0x150] sm:$0xff] }
  0x26   :  { %530 = vmatpush.bf16.msra.mxu1 %v1077_v17  ;;  %v97_v55 = vld [vmem:[#allocation2 + $0x30] sm:$0xff]  ;;  %v104_v56 = vld [vmem:[#allocation2 + $0x68] sm:$0xff]  ;;  %v1099_v60 = vld [vmem:[#allocation5 + $0x108] sm:$0xff] }
  0x27   :  { %544 = vmatpush.bf16.msra.mxu2 %v1085_v18  ;;  %v111_v59 = vpack.c.bf16 %v104_v56, %v97_v55  ;;  %v1107_v61 = vld [vmem:[#allocation5 + $0x148] sm:$0xff]  ;;  %v1098_v62 = vld [vmem:[#allocation5 + $0x100] sm:$0xff]  ;;  %v95_v0 = vld [vmem:[#allocation2 + $0x20] sm:$0xff] }
  0x28   :  { %558 = vmatpush.bf16.msra.mxu3 %v1093_v19  ;;  %v1106_v63 = vld [vmem:[#allocation5 + $0x140] sm:$0xff]  ;;  %v102_v1 = vld [vmem:[#allocation2 + $0x58] sm:$0xff]  ;;  %v96_v2 = vld [vmem:[#allocation2 + $0x28] sm:$0xff] }
  0x29   :  { %517 = vmatpush.bf16.msra.mxu0 %v1068_v20  ;;  %v103_v3 = vld [vmem:[#allocation2 + $0x60] sm:$0xff]  ;;  %v109_v4 = vpack.c.bf16 %v102_v1, %v95_v0  ;;  %v1122_v6 = vld [vmem:[#allocation7 + $0x38] sm:$0xff]  ;;  %v1121_v7 = vld [vmem:[#allocation7 + $0x30] sm:$0xff] }
  0x2a   :  { %531 = vmatpush.bf16.msra.mxu1 %v1076_v21  ;;  %v110_v5 = vpack.c.bf16 %v103_v3, %v96_v2  ;;  %v1120_v8 = vld [vmem:[#allocation7 + $0x28] sm:$0xff]  ;;  %v1119_v9 = vld [vmem:[#allocation7 + $0x20] sm:$0xff]  ;;  %v1118_v10 = vld [vmem:[#allocation7 + $0x18] sm:$0xff] }
  0x2b   :  { %545 = vmatpush.bf16.msra.mxu2 %v1084_v22  ;;  %v1117_v11 = vld [vmem:[#allocation7 + $0x10] sm:$0xff]  ;;  %v1116_v12 = vld [vmem:[#allocation7 + $0x8] sm:$0xff]  ;;  %v1115_v16 = vld [vmem:[#allocation7] sm:$0xff] }
  0x2c   :  { %559 = vmatpush.bf16.msra.mxu3 %v1092_v23  ;;  %v1145_v17 = vld [vmem:[%s1363_s2] ss:$0 sm:$0xff]  ;;  %v1130_v18 = vld [vmem:[#allocation8 + $0x38] sm:$0xff]  ;;  %v1129_v20 = vld [vmem:[#allocation8 + $0x30] sm:$0xff] }
  0x2d   :  { %518 = vmatpush.bf16.msra.mxu0 %v1067_v24  ;;  %v1146_v55 = vld [vmem:[%s1365_s4] ss:$0 sm:$0xff] }
  0x2e   :  { %532 = vmatpush.bf16.msra.mxu1 %v1075_v25  ;;  %v1128_v25 = vld [vmem:[#allocation8 + $0x28] sm:$0xff] }
  0x2f   :  { %546 = vmatpush.bf16.msra.mxu2 %v1083_v26 }
  0x30   :  { %560 = vmatpush.bf16.msra.mxu3 %v1091_v27 }
  0x31   :  { %519 = vmatpush.bf16.msra.mxu0 %v1066_v28 }
  0x32   :  { %533 = vmatpush.bf16.msra.mxu1 %v1074_v29  ;;  %v1127_v29 = vld [vmem:[#allocation8 + $0x20] sm:$0xff] }
  0x33   :  { %547 = vmatpush.bf16.msra.mxu2 %v1082_v36 }
  0x34   :  { %561 = vmatpush.bf16.msra.mxu3 %v1090_v37  ;;  %520 = vmatmul.bf16.vlgmr.msra.gmra.mxu0 %v105_v40 }
  0x35   :  { %568 = vmatpush.bf16.msrb.mxu0 %v1105_v34  ;;  %534 = vmatmul.bf16.vlgmr.msra.gmra.mxu1 %v106_v43 }
  0x36   :  { %582 = vmatpush.bf16.msrb.mxu1 %v1113_v35  ;;  %548 = vmatmul.bf16.vlgmr.msra.gmra.mxu2 %v107_v47 }
  0x37   :  { %603 = vmatpush.bf16.msrb.mxu2 %v1114_v44  ;;  %562 = vmatmul.bf16.vlgmr.msra.gmra.mxu3 %v108_v48 }
  0x38   :  { %681 = vmatpush.bf16.msrb.mxu3 %v1122_v6 }
  0x39   :  { %569 = vmatpush.bf16.msrb.mxu0 %v1104_v45 }
  0x3a   :  { %583 = vmatpush.bf16.msrb.mxu1 %v1112_v46 }
  0x3b   :  { %766 = vmatpush.bf16.msra.mxu2 %v1130_v18 }
  0x3c   :  { %682 = vmatpush.bf16.msrb.mxu3 %v1121_v7 }
  0x3d   :  { %570 = vmatpush.bf16.msrb.mxu0 %v1103_v49 }
  0x3e   :  { %584 = vmatpush.bf16.msrb.mxu1 %v1111_v50  ;;  %v1126_v50 = vld [vmem:[#allocation8 + $0x18] sm:$0xff] }
  0x3f   :  { %767 = vmatpush.bf16.msra.mxu2 %v1129_v20 }
  0x40   :  { %683 = vmatpush.bf16.msrb.mxu3 %v1120_v8 }
  0x41   :  { %571 = vmatpush.bf16.msrb.mxu0 %v1102_v51  ;;  %v1125_v51 = vld [vmem:[#allocation8 + $0x10] sm:$0xff] }
  0x42   :  { %585 = vmatpush.bf16.msrb.mxu1 %v1110_v52  ;;  %v1124_v52 = vld [vmem:[#allocation8 + $0x8] sm:$0xff] }
  0x43   :  { %768 = vmatpush.bf16.msra.mxu2 %v1128_v25 }
  0x44   :  { %684 = vmatpush.bf16.msrb.mxu3 %v1119_v9 }
  0x45   :  { %572 = vmatpush.bf16.msrb.mxu0 %v1101_v53  ;;  %v1123_v53 = vld [vmem:[#allocation8] sm:$0xff] }
  0x46   :  { %586 = vmatpush.bf16.msrb.mxu1 %v1109_v54  ;;  %1001 = vmatmul.msk.bf16.vlgmr.msrb.gmra.mxu2 %vm508_vm0, %v111_v59 }
  0x47   :  { %769 = vmatpush.bf16.msra.mxu2 %v1127_v29 }
  0x48   :  { %685 = vmatpush.bf16.msrb.mxu3 %v1118_v10 }
  0x49   :  { %573 = vmatpush.bf16.msrb.mxu0 %v1100_v57 }
  0x4a   :  { %587 = vmatpush.bf16.msrb.mxu1 %v1108_v58 }
  0x4b   :  { %770 = vmatpush.bf16.msra.mxu2 %v1126_v50 }
  0x4c   :  { %686 = vmatpush.bf16.msrb.mxu3 %v1117_v11 }
  0x4d   :  { %574 = vmatpush.bf16.msrb.mxu0 %v1099_v60 }
  0x4e   :  { %588 = vmatpush.bf16.msrb.mxu1 %v1107_v61 }
  0x4f   :  { %771 = vmatpush.bf16.msra.mxu2 %v1125_v51 }
  0x50   :  { %687 = vmatpush.bf16.msrb.mxu3 %v1116_v12 }
  0x51   :  { %575 = vmatpush.bf16.msrb.mxu0 %v1098_v62 }
  0x52   :  { %589 = vmatpush.bf16.msrb.mxu1 %v1106_v63  ;;  %v1147_v63 = vld [vmem:[%s1367_s6] ss:$0 sm:$0xff] }
  0x53   :  { %772 = vmatpush.bf16.msra.mxu2 %v1124_v52 }
  0x54   :  { %576 = vmatmul.bf16.vlgmr.msrb.gmra.mxu0 %v109_v4  ;;  %688 = vmatpush.bf16.msrb.mxu3 %v1115_v16 }
  0x55   :  { %590 = vmatmul.bf16.vlgmr.msrb.gmra.mxu1 %v110_v5 }
  0x57   :  { %773 = vmatpush.bf16.msra.mxu2 %v1123_v53 }
  0xb1   :  { %v521_v13 = vpop.f32.mrf.mxu0 }
  0xb2   :  { %v535_v14 = vpop.f32.mrf.mxu1  ;;  %v522_v19 = vadd.f32 %v1145_v17, %v521_v13 }
  0xb4   :  { %v536_v24 = vadd.f32 %v535_v14, %v522_v19 }
  0xb9   :  { %v549_v15 = vpop.f32.mrf.mxu2  ;;  %v523_v21 = vpop.f32.mrf.mxu0 }
  0xba   :  { %v537_v22 = vpop.f32.mrf.mxu1  ;;  %v563_v26 = vpop.f32.mrf.mxu3  ;;  %v524_v27 = vadd.f32 %v1145_v17, %v523_v21  ;;  %v550_v28 = vadd.f32 %v549_v15, %v536_v24 }
  0xbc   :  { %v538_v30 = vadd.f32 %v537_v22, %v524_v27  ;;  %v564_v33 = vadd.f32 %v563_v26, %v550_v28 }
  0xc1   :  { %v551_v23 = vpop.f32.mrf.mxu2 }
  0xc2   :  { %v552_v35 = vadd.f32 %v551_v23, %v538_v30  ;;  %v565_v37 = vpop.f32.mrf.mxu3 }
  0xc4   :  { %v566_v38 = vadd.f32 %v565_v37, %v552_v35 }
  0xc9   :  { %v605_v34 = vpop.f32.mrf.mxu2 }
  0xd1   :  { %v577_v31 = vpop.f32.mrf.mxu0  ;;  %v607_v45 = vpop.f32.mrf.mxu2 }
  0xd2   :  { %v591_v32 = vpop.f32.mrf.mxu1  ;;  %v578_v36 = vadd.f32 %v577_v31, %v564_v33 }
  0xd4   :  { %v592_v39 = vadd.f32 %v591_v32, %v578_v36 }
  0xd6   :  { %v606_v43 = vadd.f32 %v605_v34, %v592_v39 }
  0xd8   :  { %v610_v47 = vmax.f32 %v606_v43, 0.0 }
  0xd9   :  { %v579_v40 = vpop.f32.mrf.mxu0 }
  0xda   :  { %v580_v41 = vadd.f32 %v579_v40, %v566_v38  ;;  %v593_v42 = vpop.f32.mrf.mxu1 }
  0xdc   :  { %v594_v44 = vadd.f32 %v593_v42, %v580_v41 }
  0xde   :  { %v608_v46 = vadd.f32 %v607_v45, %v594_v44 }
  0xe0   :  { %v611_v48 = vmax.f32 %v608_v46, 0.0 }
  0xe2   :  { %v612_v49 = vpack.c.bf16 %v611_v48, %v610_v47 }
  0xe4   :  { %689 = vmatmul.bf16.vlgmr.msrb.gmra.mxu3 %v612_v49 }
 0x167   :  { %v690_v54 = vpop.f32.mrf.mxu3 }
 0x168   :  { %v691_v56 = vadd.f32 %v1146_v55, %v690_v54 }
 0x16a   :  { %v695_v59 = vmax.f32 %v691_v56, 0.0 }
 0x16f   :  { %v692_v57 = vpop.f32.mrf.mxu3 }
 0x170   :  { %v693_v58 = vadd.f32 %v1146_v55, %v692_v57 }
 0x172   :  { %v696_v60 = vmax.f32 %v693_v58, 0.0 }
 0x174   :  { %v697_v61 = vpack.c.bf16 %v696_v60, %v695_v59 }
 0x176   :  { %774 = vmatmul.bf16.vlgmr.msra.gmra.mxu2 %v697_v61 }
 0x1f9   :  { %v775_v62 = vpop.f32.mrf.mxu2 }
 0x1fa   :  { %v776_v1 = vadd.f32 %v1147_v63, %v775_v62 }
 0x201   :  { %v777_v0 = vpop.f32.mrf.mxu2 }
 0x202   :  { %v778_v2 = vadd.f32 %v1147_v63, %v777_v0 }
 0x204   :  { %v1134_v3 = vpack.c.bf16 %v778_v2, %v776_v1 }
 0x206   :  { %1135 = vst [vmem:[#allocation10] sm:$0xff] %v1134_v3  }
 0x207   :  { %796 = dma.vmem_to_hbm [thread:$0]  %s789_s27, 128, %s791_s30, [#allocation4], %s1277_s9, %s1277_s9, %s1278_s10  }
 0x208   :  { %1274 = dma.done.wait [#allocation4], 128  }
 0x209   :  { %1275 = vsyncadd [#allocation4], 4294967168 }
 0x20a   :  { %801 = vsyncpa [#allocation3], 1 }
 0x20b   :  { %802 = vsyncpa [#allocation6], 1 }
 0x20c   :  { %803 = vsyncpa [#allocation9], 1 }
 0x20d   :  { %804 = vsyncpa [#allocation4], 1 }

</bundles_post_ra>
